<compile_context>
chip_gen: v7x
topology: tpu7x:2x2x1
jax: 0.10.0
libtpu: 0.0.40
codegen_flags: <defaults>
</compile_context>

<pallas_src>
import jax
import jax.numpy as jnp
from jax import lax
from jax.experimental import pallas as pl
from jax.experimental.pallas import tpu as pltpu

# ----------------------------- config (small, forward-implied shapes) --------
B = 2            # batch
S = 8            # sequence length
H = 32           # hidden size
C = 3            # num_classes


# ----------------------------- Pallas kernel ----------------------------------
def dac_kernel(hs_ref, ids_ref, wq_ref, w1t_ref, b1_ref, w2t_ref, b2_ref, out_ref):
    b, s, h = hs_ref.shape            # static
    nhead = wq_ref.shape[0]           # 3

    hs = hs_ref[...]                  # [B, S, H] f32
    ids = ids_ref[...]                # [B, 1, S] i32

    # ---- mask derivation (get_mask) fused in-kernel --------------------------
    pad = ids == 0
    cls = ids == 1
    sep = ids == 2
    content = jnp.logical_not(pad | cls | sep)                       # [B,1,S]
    # cumsum(sep, axis=seq) > 0  <=>  position >= first SEP position
    pos = lax.broadcasted_iota(jnp.int32, (b, 1, s), 2)              # [B,1,S]
    first_sep = jnp.min(jnp.where(sep, pos, s), axis=-1, keepdims=True)  # [B,1,1]
    after_sep = pos >= first_sep                                     # [B,1,S]
    b_m = content & after_sep
    a_m = content & jnp.logical_not(after_sep)

    # additive bias (1.0 = masked -> large finite negative; no -inf NaN hazard)
    neg = jnp.float32(-1e30)
    head = lax.broadcasted_iota(jnp.int32, (b, nhead, s), 1)         # [B,3,S]
    padf = pad.astype(jnp.float32)
    af = a_m.astype(jnp.float32)
    bf = b_m.astype(jnp.float32)
    msel = jnp.where(head == 0, padf, jnp.where(head == 1, af, bf))  # [B,3,S]
    bias = msel * neg

    # ---- all three attention heads via two batched MXU contractions ----------
    wq_b = jnp.broadcast_to(wq_ref[...][None], (b, nhead, h))        # [B,3,H]
    scores = jnp.einsum("bkh,bsh->bks", wq_b, hs,
                        preferred_element_type=jnp.float32) + bias   # [B,3,S]
    m = jnp.max(scores, axis=-1, keepdims=True)
    e = jnp.exp(scores - m)
    denom = jnp.sum(e, axis=-1, keepdims=True)
    w = e * pl.reciprocal(denom, approx=True)                        # [B,3,S]
    att = jnp.einsum("bks,bsh->bkh", w, hs,
                     preferred_element_type=jnp.float32)             # [B,3,H]

    interact_h = att[:, 0, :]                                        # [B,H]
    a_h = att[:, 1, :]
    b_h = att[:, 2, :]
    feat = jnp.concatenate(
        [interact_h, a_h, b_h, a_h * b_h, a_h - b_h], axis=-1)       # [B,5H]

    # ---- fused 5H->3H matmul + ReLU, then 3H->C output projection -------------
    z = jnp.maximum(
        jnp.dot(feat, w1t_ref[...], preferred_element_type=jnp.float32)
        + b1_ref[...], 0.0)                                          # [B,3H]
    # Dropout(p=0.3) in eval mode is identity.
    out_ref[...] = (jnp.dot(z, w2t_ref[...], preferred_element_type=jnp.float32)
                    + b2_ref[...])                                   # [B,C]


# ----------------------------- wrapper -----------------------------------------
@jax.jit
def deep_attention_classifier(hidden_states, input_ids, wq, w1t, b1, w2t, b2):
    bsz, seq, _ = hidden_states.shape
    c = w2t.shape[-1]
    ids3 = input_ids.reshape(bsz, 1, seq).astype(jnp.int32)   # lane-major ids
    vmem = pl.BlockSpec(memory_space=pltpu.MemorySpace.VMEM)
    return pl.pallas_call(
        dac_kernel,
        out_shape=jax.ShapeDtypeStruct((bsz, c), jnp.float32),
        in_specs=[vmem] * 7,
        out_specs=vmem,
    )(hidden_states, ids3, wq, w1t, b1, w2t, b2)


# ----------------------------- pure-JAX reference (mirrors PyTorch) ------------
def get_mask_ref(input_ids):
    pad = input_ids == 0
    cls = input_ids == 1
    sep = input_ids == 2
    content = ~(pad | cls | sep)
    tmp = jnp.cumsum(sep.astype(jnp.int32), axis=1) > 0
    b_mask = content & tmp
    a_mask = content ^ b_mask
    return pad, a_mask, b_mask


def reference(hidden_states, input_ids, wq, w1t, b1, w2t, b2):
    masks = get_mask_ref(input_ids)

    def attend(k):
        q = jnp.einsum("bsh,h->bs", hidden_states, wq[k])
        q = jnp.where(masks[k], -jnp.inf, q)
        w = jax.nn.softmax(q, axis=-1)
        return jnp.einsum("bs,bsh->bh", w, hidden_states)

    ih, ah, bh = attend(0), attend(1), attend(2)
    final = jnp.concatenate([ih, ah, bh, ah * bh, ah - bh], axis=1)
    z = jnp.maximum(final @ w1t + b1, 0.0)
    return z @ w2t + b2


# ----------------------------- main ---------------------------------------------
if __name__ == "__main__":
    key = jax.random.PRNGKey(0)
    k_hs, k_wq, k_w1, k_b1, k_w2, k_b2 = jax.random.split(key, 6)

    hidden_states = jax.random.normal(k_hs, (B, S, H), dtype=jnp.float32)
    # token ids: 0=PAD, 1=CLS, 2=SEP, >2 content
    input_ids = jnp.array(
        [[1, 5, 6, 7, 2, 8, 9, 2],
         [1, 10, 11, 2, 12, 2, 0, 0]], dtype=jnp.int32)

    # Deterministic parameter init (shapes follow the module's __init__).
    wq = jax.random.normal(k_wq, (3, H), dtype=jnp.float32) / jnp.sqrt(H)            # 3x Linear(H,1)
    w1t = jax.random.normal(k_w1, (5 * H, 3 * H), dtype=jnp.float32) / jnp.sqrt(5 * H)  # Linear(5H,3H) weight^T
    b1 = jax.random.normal(k_b1, (1, 3 * H), dtype=jnp.float32) * 0.01
    w2t = jax.random.normal(k_w2, (3 * H, C), dtype=jnp.float32) / jnp.sqrt(3 * H)      # Linear(3H,C) weight^T
    b2 = jax.random.normal(k_b2, (1, C), dtype=jnp.float32) * 0.01

    logits = deep_attention_classifier(hidden_states, input_ids, wq, w1t, b1, w2t, b2)
    logits = jax.block_until_ready(logits)

    ref = reference(hidden_states, input_ids, wq, w1t, b1, w2t, b2)
    assert logits.shape == (B, C)
    assert bool(jnp.all(jnp.isfinite(logits)))
    # Loose tolerance only because the kernel uses the EUP approximate
    # reciprocal (pl.reciprocal(approx=True)) in the softmax normalization.
    assert jnp.allclose(logits, ref, atol=2e-2, rtol=2e-2), (logits, ref)

    print("KERNEL_OK")
</pallas_src>

<mosaic_0001>
module attributes {stable_mosaic.version = 11 : i64} {
  func.func @dac_kernel(%arg0: memref<2x8x32xf32, #tpu.memory_space<vmem>>, %arg1: memref<2x1x8xi32, #tpu.memory_space<vmem>>, %arg2: memref<3x32xf32, #tpu.memory_space<vmem>>, %arg3: memref<160x96xf32, #tpu.memory_space<vmem>>, %arg4: memref<1x96xf32, #tpu.memory_space<vmem>>, %arg5: memref<96x3xf32, #tpu.memory_space<vmem>>, %arg6: memref<1x3xf32, #tpu.memory_space<vmem>>, %arg7: memref<2x3xf32, #tpu.memory_space<vmem>>) attributes {dimension_semantics = [], scalar_prefetch = 0 : i64, scratch_operands = 0 : i64, tpu.core_type = #tpu.core_type<tc>} {
    %c0 = arith.constant 0 : index
    %c0_0 = arith.constant 0 : index
    %c0_1 = arith.constant 0 : index
    %0 = vector.load %arg0[%c0, %c0_0, %c0_1] : memref<2x8x32xf32, #tpu.memory_space<vmem>>, vector<2x8x32xf32>
    %c0_2 = arith.constant 0 : index
    %c0_3 = arith.constant 0 : index
    %c0_4 = arith.constant 0 : index
    %1 = vector.load %arg1[%c0_2, %c0_3, %c0_4] : memref<2x1x8xi32, #tpu.memory_space<vmem>>, vector<2x1x8xi32>
    %c0_i32 = arith.constant 0 : i32
    %2 = vector.broadcast %c0_i32 : i32 to vector<2x1x8xi32>
    %3 = arith.cmpi eq, %1, %2 : vector<2x1x8xi32>
    %c1_i32 = arith.constant 1 : i32
    %4 = vector.broadcast %c1_i32 : i32 to vector<2x1x8xi32>
    %5 = arith.cmpi eq, %1, %4 : vector<2x1x8xi32>
    %c2_i32 = arith.constant 2 : i32
    %6 = vector.broadcast %c2_i32 : i32 to vector<2x1x8xi32>
    %7 = arith.cmpi eq, %1, %6 : vector<2x1x8xi32>
    %8 = arith.ori %3, %5 : vector<2x1x8xi1>
    %9 = arith.ori %8, %7 : vector<2x1x8xi1>
    %cst = arith.constant dense<true> : vector<2x1x8xi1>
    %10 = arith.xori %9, %cst : vector<2x1x8xi1>
    %11 = tpu.iota {dimensions = array<i32: 2>} : vector<2x1x8xi32>
    %c8_i32 = arith.constant 8 : i32
    %12 = vector.broadcast %c8_i32 : i32 to vector<2x1x8xi32>
    %13 = arith.select %7, %11, %12 : vector<2x1x8xi1>, vector<2x1x8xi32>
    %cst_5 = arith.constant dense<2147483647> : vector<2x1xi32>
    %14 = vector.multi_reduction <minsi>, %13, %cst_5 [2] : vector<2x1x8xi32> to vector<2x1xi32>
    %15 = vector.shape_cast %14 : vector<2x1xi32> to vector<2x1x1xi32>
    %16 = vector.broadcast %15 : vector<2x1x1xi32> to vector<2x1x8xi32>
    %17 = arith.cmpi sge, %11, %16 : vector<2x1x8xi32>
    %18 = arith.andi %10, %17 : vector<2x1x8xi1>
    %cst_6 = arith.constant dense<true> : vector<2x1x8xi1>
    %19 = arith.xori %17, %cst_6 : vector<2x1x8xi1>
    %20 = arith.andi %10, %19 : vector<2x1x8xi1>
    %21 = tpu.iota {dimensions = array<i32: 1>} : vector<2x3x8xi32>
    %22 = arith.extui %3 : vector<2x1x8xi1> to vector<2x1x8xi32>
    %23 = arith.sitofp %22 : vector<2x1x8xi32> to vector<2x1x8xf32>
    %24 = arith.extui %20 : vector<2x1x8xi1> to vector<2x1x8xi32>
    %25 = arith.sitofp %24 : vector<2x1x8xi32> to vector<2x1x8xf32>
    %26 = arith.extui %18 : vector<2x1x8xi1> to vector<2x1x8xi32>
    %27 = arith.sitofp %26 : vector<2x1x8xi32> to vector<2x1x8xf32>
    %c0_i32_7 = arith.constant 0 : i32
    %28 = vector.broadcast %c0_i32_7 : i32 to vector<2x3x8xi32>
    %29 = arith.cmpi eq, %21, %28 : vector<2x3x8xi32>
    %c1_i32_8 = arith.constant 1 : i32
    %30 = vector.broadcast %c1_i32_8 : i32 to vector<2x3x8xi32>
    %31 = arith.cmpi eq, %21, %30 : vector<2x3x8xi32>
    %32 = vector.shape_cast %25 : vector<2x1x8xf32> to vector<2x1x8xf32>
    %33 = vector.broadcast %32 : vector<2x1x8xf32> to vector<2x3x8xf32>
    %34 = vector.shape_cast %27 : vector<2x1x8xf32> to vector<2x1x8xf32>
    %35 = vector.broadcast %34 : vector<2x1x8xf32> to vector<2x3x8xf32>
    %36 = arith.select %31, %33, %35 : vector<2x3x8xi1>, vector<2x3x8xf32>
    %37 = vector.shape_cast %23 : vector<2x1x8xf32> to vector<2x1x8xf32>
    %38 = vector.broadcast %37 : vector<2x1x8xf32> to vector<2x3x8xf32>
    %39 = arith.select %29, %38, %36 : vector<2x3x8xi1>, vector<2x3x8xf32>
    %cst_9 = arith.constant -1.000000e+30 : f32
    %40 = vector.broadcast %cst_9 : f32 to vector<2x3x8xf32>
    %41 = arith.mulf %39, %40 : vector<2x3x8xf32>
    %c0_10 = arith.constant 0 : index
    %c0_11 = arith.constant 0 : index
    %42 = vector.load %arg2[%c0_10, %c0_11] : memref<3x32xf32, #tpu.memory_space<vmem>>, vector<3x32xf32>
    %43 = vector.shape_cast %42 : vector<3x32xf32> to vector<1x3x32xf32>
    %44 = vector.shape_cast %43 : vector<1x3x32xf32> to vector<1x3x32xf32>
    %45 = vector.broadcast %44 : vector<1x3x32xf32> to vector<2x3x32xf32>
    "tpu.trace_start"() <{level = 10 : i32, message = "bkh,bsh->bks"}> : () -> ()
    %cst_12 = arith.constant dense<0.000000e+00> : vector<2x3x8xf32>
    %46 = tpu.matmul %45, %0, %cst_12 {dimension_numbers = #tpu.dot_dimension_numbers<[2], [2], [1], [1], [0, 0, 0, 1, 1, 1], [0], [0]>} : vector<2x3x32xf32>, vector<2x8x32xf32>, vector<2x3x8xf32> -> vector<2x3x8xf32>
    "tpu.trace_stop"() : () -> ()
    %47 = arith.addf %46, %41 : vector<2x3x8xf32>
    %cst_13 = arith.constant dense<0xFF800000> : vector<2x3xf32>
    %48 = vector.multi_reduction <maximumf>, %47, %cst_13 [2] : vector<2x3x8xf32> to vector<2x3xf32>
    %49 = vector.shape_cast %48 : vector<2x3xf32> to vector<2x3x1xf32>
    %50 = vector.broadcast %49 : vector<2x3x1xf32> to vector<2x3x8xf32>
    %51 = arith.subf %47, %50 : vector<2x3x8xf32>
    %52 = math.exp %51 : vector<2x3x8xf32>
    %cst_14 = arith.constant dense<0.000000e+00> : vector<2x3xf32>
    %53 = vector.multi_reduction <add>, %52, %cst_14 [2] : vector<2x3x8xf32> to vector<2x3xf32>
    %54 = vector.shape_cast %53 : vector<2x3xf32> to vector<2x3x1xf32>
    %55 = tpu.reciprocal %54 {approx = true} : vector<2x3x1xf32> -> vector<2x3x1xf32>
    %56 = vector.broadcast %55 : vector<2x3x1xf32> to vector<2x3x8xf32>
    %57 = arith.mulf %52, %56 : vector<2x3x8xf32>
    "tpu.trace_start"() <{level = 10 : i32, message = "bks,bsh->bkh"}> : () -> ()
    %cst_15 = arith.constant dense<0.000000e+00> : vector<2x3x32xf32>
    %58 = tpu.matmul %57, %0, %cst_15 {dimension_numbers = #tpu.dot_dimension_numbers<[2], [1], [1], [2], [0, 0, 0, 1, 1, 2], [0], [0]>} : vector<2x3x8xf32>, vector<2x8x32xf32>, vector<2x3x32xf32> -> vector<2x3x32xf32>
    "tpu.trace_stop"() : () -> ()
    %59 = vector.extract_strided_slice %58 {offsets = [0, 0, 0], sizes = [2, 1, 32], strides = [1, 1, 1]} : vector<2x3x32xf32> to vector<2x1x32xf32>
    %60 = vector.shape_cast %59 : vector<2x1x32xf32> to vector<2x32xf32>
    %61 = vector.extract_strided_slice %58 {offsets = [0, 1, 0], sizes = [2, 1, 32], strides = [1, 1, 1]} : vector<2x3x32xf32> to vector<2x1x32xf32>
    %62 = vector.shape_cast %61 : vector<2x1x32xf32> to vector<2x32xf32>
    %63 = vector.extract_strided_slice %58 {offsets = [0, 2, 0], sizes = [2, 1, 32], strides = [1, 1, 1]} : vector<2x3x32xf32> to vector<2x1x32xf32>
    %64 = vector.shape_cast %63 : vector<2x1x32xf32> to vector<2x32xf32>
    %65 = arith.mulf %62, %64 : vector<2x32xf32>
    %66 = arith.subf %62, %64 : vector<2x32xf32>
    %67 = tpu.concatenate %60, %62, %64, %65, %66 in 1 : vector<2x32xf32>, vector<2x32xf32>, vector<2x32xf32>, vector<2x32xf32>, vector<2x32xf32> -> vector<2x160xf32>
    %c0_16 = arith.constant 0 : index
    %c0_17 = arith.constant 0 : index
    %68 = vector.load %arg3[%c0_16, %c0_17] : memref<160x96xf32, #tpu.memory_space<vmem>>, vector<160x96xf32>
    %cst_18 = arith.constant dense<0.000000e+00> : vector<2x96xf32>
    %69 = tpu.matmul %67, %68, %cst_18 {dimension_numbers = #tpu.dot_dimension_numbers<[1], [0], [0], [1], [0, 0, 1, 1], [], []>} : vector<2x160xf32>, vector<160x96xf32>, vector<2x96xf32> -> vector<2x96xf32>
    %c0_19 = arith.constant 0 : index
    %c0_20 = arith.constant 0 : index
    %70 = vector.load %arg4[%c0_19, %c0_20] : memref<1x96xf32, #tpu.memory_space<vmem>>, vector<1x96xf32>
    %71 = vector.broadcast %70 : vector<1x96xf32> to vector<2x96xf32>
    %72 = arith.addf %69, %71 : vector<2x96xf32>
    %cst_21 = arith.constant 0.000000e+00 : f32
    %73 = vector.broadcast %cst_21 : f32 to vector<2x96xf32>
    %74 = arith.maximumf %72, %73 : vector<2x96xf32>
    %c0_22 = arith.constant 0 : index
    %c0_23 = arith.constant 0 : index
    %75 = vector.load %arg5[%c0_22, %c0_23] : memref<96x3xf32, #tpu.memory_space<vmem>>, vector<96x3xf32>
    %cst_24 = arith.constant dense<0.000000e+00> : vector<2x3xf32>
    %76 = tpu.matmul %74, %75, %cst_24 {dimension_numbers = #tpu.dot_dimension_numbers<[1], [0], [0], [1], [0, 0, 1, 1], [], []>} : vector<2x96xf32>, vector<96x3xf32>, vector<2x3xf32> -> vector<2x3xf32>
    %c0_25 = arith.constant 0 : index
    %c0_26 = arith.constant 0 : index
    %77 = vector.load %arg6[%c0_25, %c0_26] : memref<1x3xf32, #tpu.memory_space<vmem>>, vector<1x3xf32>
    %78 = vector.broadcast %77 : vector<1x3xf32> to vector<2x3xf32>
    %79 = arith.addf %76, %78 : vector<2x3xf32>
    %c0_27 = arith.constant 0 : index
    %c0_28 = arith.constant 0 : index
    %80 = vector.load %arg7[%c0_27, %c0_28] : memref<2x3xf32, #tpu.memory_space<vmem>>, vector<2x3xf32>
    tpu.vector_store %arg7[%c0_27, %c0_28], %79 {strides = array<i32>} : memref<2x3xf32, #tpu.memory_space<vmem>>, vector<2x3xf32>,
    return
  }
}

</mosaic_0001>

<bundles_post_ra>
// kernel: deep_attention_classifier.1
= control target key start
LH: loop header
LB: loop body
LE: loop exit
PB: predicated region body
PF: predicated region fallthrough
CT: control target
= control target key end

     0   :  { %12 = vsyncpa [#allocation3], 0  ;;  %s1149_s0 = inlined_call_operand.vmem [shape: f32[2,8,32], index: 0, kind: input, shape index: {}]   ;;  %s1150_s1 = inlined_call_operand.vmem [shape: s32[2,1,8], index: 1, kind: input, shape index: {}]   ;;  %s1151_s2 = inlined_call_operand.vmem [shape: f32[3,32], index: 2, kind: input, shape index: {}]   ;;  %s1152_s3 = inlined_call_operand.hbm [shape: f32[160,96], index: 3, kind: input, shape index: {}]   ;;  %s1153_s4 = inlined_call_operand.vmem [shape: f32[1,96], index: 4, kind: input, shape index: {}]   ;;  %s1154_s5 = inlined_call_operand.vmem [shape: f32[96,3], index: 5, kind: input, shape index: {}]   ;;  %s1155_s6 = inlined_call_operand.vmem [shape: f32[1,3], index: 6, kind: input, shape index: {}]   ;;  %s1156_s7 = inlined_call_operand.hbm [shape: f32[2,3], index: 7, kind: output, shape index: {}]  }
   0x1   :  { %13 = vsyncpa [#allocation4], 0  ;;  %s926_s24 = smov [#allocation2]   ;;  %s878_s28 = scalar_lea.hbm %s1152_s3, 2560 }
   0x2   :  { %s25_s25 = sshll.u32 %s926_s24, 4  ;;  %p879_p0 = scmp.ne.s32.totalorder %s1152_s3, %s878_s28  ;;  %s26_s25 = int_to_ptr.vmem [resolvable:$true] %s25_s25 }
   0x3   :  { %p882_p1 = scmp.lt.u32.totalorder %s878_s28, %s1152_s3 }
   0x5   :  { %p884_p2 = pnand %p882_p1, %p879_p0 }
   0x7   :  { %887 = shalt.err (!%p884_p2)
}
   0x8   :  { %s888_s10 = scalar_lea.vmem %s26_s25, 2560  ;;  %p893_p4 = scmp.lt.s32.totalorder %s26_s25, %s26_s25 }
   0x9   :  { %p889_p3 = scmp.ne.s32.totalorder %s26_s25, %s888_s10  ;;  %p894_p5 = scmp.lt.s32.totalorder %s888_s10, %s888_s10 }
   0xb   :  { %p895_p6 = por %p894_p5, %p893_p4 }
   0xd   :  { %p896_p7 = pnand %p895_p6, %p889_p3 }
   0xf   :  { %899 = shalt.err (!%p896_p7)
}
  0x10   :  { %s927_s11 = smov 128   ;;  %s928_s12 = smov 8  }
  0x11   :  { %31 = dma.hbm_to_vmem [thread:$0]  %s1152_s3, 2560, %s26_s25, [#allocation3], %s927_s11, %s927_s11, %s928_s12  }
  0x12   :  { %922 = dma.done.wait [#allocation3], 2560  }
  0x13   :  { %923 = vsyncadd [#allocation3], 4294964736  ;;  %v57_v0 = vlaneseq  ;;  %v929_v1 = vmov 0.0   ;;  %vm930_vm0 = vmmov 0   ;;  %vm159_vm1 = vcmask 261120   ;;  %v41_v5 = vld [vmem:[%s1149_s0] sm:$0xff] }
  0x14   :  { %764 = vmatprep.subr.mxu1 %v929_v1  ;;  %766 = vmatprep.mubr.msk.f32.mxu1 %vm930_vm0, %v929_v1  ;;  %v43_v3 = vld [vmem:[%s1150_s1] sm:$0x1]  ;;  %vm61_vm2 = vcmask 57344   ;;  %v44_v4 = vld [vmem:[%s1150_s1 + $0x1] sm:$0x1]  ;;  %v1013_v8 = vld [vmem:[%s1149_s0 + $0x8] sm:$0xff] }
  0x15   :  { %v992_v2 = vand.u32 127, %v57_v0  ;;  %vm49_vm3 = vcmp.eq.s32.totalorder %v43_v3, 2  ;;  %vm45_vm4 = vcmp.eq.s32.totalorder %v43_v3, 0  ;;  %vm47_vm5 = vcmp.eq.s32.totalorder %v43_v3, 1  ;;  %765 = vmatpush3.xpose.msk.msra.mxu1 %vm159_vm1, %v41_v5  ;;  %v158_v6 = vld [vmem:[%s1151_s2] sm:$0x7] }
  0x16   :  { %vm46_vm6 = vcmp.eq.s32.totalorder %v44_v4, 0  ;;  %vm51_vm7 = vmor %vm45_vm4, %vm47_vm5  ;;  %vm48_vm8 = vcmp.eq.s32.totalorder %v44_v4, 1  ;;  %vm50_vm9 = vcmp.eq.s32.totalorder %v44_v4, 2  ;;  %769 = vmatprep.subr.mxu1 %v929_v1  ;;  %v101_v26 = vshrl.u32 %v57_v0, 7  ;;  %s933_s10 = smov 32   ;;  %s934_s11 = smov 64  }
  0x17   :  { %v59_v7 = vsel %vm49_vm3, %v992_v2, 8  ;;  %vm1016_vm10 = vmor %vm51_vm7, %vm49_vm3  ;;  %v60_v11 = vsel %vm50_vm9, %v992_v2, 8  ;;  %v727_v28 = vsel %vm45_vm4, 1.0, %v929_v1  ;;  %v728_v30 = vsel %vm46_vm6, 1.0, %v929_v1  ;;  %s935_s16 = smov 96   ;;  %s936_s25 = smov [#allocation5]  }
  0x18   :  { %v62_v9 = vsel %vm61_vm2, %v59_v7, 2147483647  ;;  %vm52_vm11 = vmor %vm46_vm6, %vm48_vm8  ;;  %v77_v13 = vsel %vm61_vm2, %v60_v11, 2147483647  ;;  %767 = vmatmul.mubr.msk.f32.vlgmr.msra.gmra.mrb[0].mxu1 %vm159_vm1, %v158_v6  ;;  %v120_v27 = vsub.s32 0, %v101_v26  ;;  %vm931_vm15 = vmmov 1  }
  0x19   :  { %v64_v12 = vshra.s32 %v62_v9, 16  ;;  %vm1024_vm12 = vmor %vm52_vm11, %vm50_vm9  ;;  %v79_v15 = vshra.s32 %v77_v13, 16  ;;  %770 = vmatpush3.xpose.msk.msra.mxu1 %vm159_vm1, %v1013_v8  ;;  %771 = vmatprep.mubr.msk.f32.mxu1 %vm930_vm0, %v929_v1  ;;  %v63_v18 = vand.u32 65535, %v62_v9  ;;  %v78_v20 = vand.u32 65535, %v77_v13  ;;  %s718_s26 = sshll.u32 %s936_s25, 4  ;;  %s719_s26 = int_to_ptr.vmem [resolvable:$true] %s718_s26 }
  0x1a   :  { %774 = vmatprep.subr.mxu1 %v929_v1  ;;  %v147_v29 = vrot.slane %v727_v28, %v120_v27  ;;  %v151_v31 = vrot.slane %v728_v30, %v120_v27  ;;  %vm55_vm2 = vmxor %vm1016_vm10, %vm931_vm15  ;;  %vm115_vm9 = vcmp.eq.s32.totalorder %v101_v26, 1  ;;  %vm114_vm11 = vcmp.eq.s32.totalorder %v101_v26, 0  ;;  %v523_v26 = vld [vmem:[#allocation2 + $0x28] sm:$0xff]  ;;  %v525_v28 = vld [vmem:[#allocation2 + $0x38] sm:$0xff]  ;;  %p905_p9 = scmp.lt.s32.totalorder %s719_s26, %s719_s26 }
  0x1b   :  { %v66_v16 = vcvt.s32.f32 %v64_v12  ;;  %v81_v17 = vcvt.s32.f32 %v79_v15  ;;  %v65_v19 = vcvt.s32.f32 %v63_v18  ;;  %v80_v23 = vcvt.s32.f32 %v78_v20  ;;  %vm1048_vm4 = vmxor %vm1024_vm12, %vm931_vm15  ;;  %v519_v20 = vld [vmem:[#allocation2 + $0x8] sm:$0xff]  ;;  %v526_v30 = vld [vmem:[#allocation2 + $0x40] sm:$0xff] }
  0x1c   :  { %772 = vmatmul.mubr.msk.f32.vlgmr.msra.gmra.mrb[2].mxu1 %vm159_vm1, %v158_v6 }
  0x1d   :  { %67 = vmin.xlane.f32.xlu0 %v66_v16  ;;  %775 = vmatpush3.msra.mxu1 %v41_v5 }
  0x1e   :  { %776 = vmatprep.mubr.msk.f32.mxu1 %vm930_vm0, %v929_v1  ;;  %779 = vmatprep.subr.mxu1 %v929_v1 }
  0x21   :  { %82 = vmin.xlane.f32.xlu0 %v81_v17 }
  0xaa   :  { %v68_v21 = vpop.xlane.xlu0 %67 }
  0xab   :  { %vm69_vm13 = vcmp.eq.f32.partialorder %v66_v16, %v68_v21  ;;  %v74_v36 = vcvt.f32.s32 %v68_v21  ;;  %v520_v21 = vld [vmem:[#allocation2 + $0x10] sm:$0xff] }
  0xac   :  { %v70_v22 = vsel %vm69_vm13, %v65_v19, inf  ;;  %v518_v19 = vld [vmem:[#allocation2] sm:$0xff] }
  0xad   :  { %71 = vmin.xlane.f32.xlu1 %v70_v22  ;;  %v75_v38 = vshll.u32 %v74_v36, 16  ;;  %v932_v22 = vmov 0.0|0.0   ;;  %v530_v36 = vld [vmem:[#allocation2 + $0x60] sm:$0xff] }
  0xae   :  { %v83_v24 = vpop.xlane.xlu0 %82  ;;  %811 = vmatprep.subr.bf16.mxu0 %v932_v22 }
  0xaf   :  { %vm84_vm14 = vcmp.eq.f32.partialorder %v81_v17, %v83_v24  ;;  %v89_v39 = vcvt.f32.s32 %v83_v24  ;;  %v521_v24 = vld [vmem:[#allocation2 + $0x18] sm:$0xff] }
  0xb0   :  { %v85_v25 = vsel %vm84_vm14, %v80_v23, inf  ;;  %vm309_vm14 = vcmask 59392   ;;  %v812_v23 = vpack.c.bf16 %v519_v20, %v518_v19 }
  0xb1   :  { %86 = vmin.xlane.f32.xlu1 %v85_v25  ;;  %v90_v43 = vshll.u32 %v89_v39, 16  ;;  %v522_v25 = vld [vmem:[#allocation2 + $0x20] sm:$0xff]  ;;  %v532_v39 = vld [vmem:[#allocation2 + $0x70] sm:$0xff] }
  0xb2   :  { %813 = vmatpush1.bf16.msra.mxu0 %v812_v23 }
  0xb3   :  { %814 = vmatprep.subr.bf16.mxu0 %v932_v22 }
  0xeb   :  { %v232_v32 = vpop.f32.mrb[0].mxu1 }
  0xec   :  { %v768_v33 = vpop.f32.mrb[1].mxu1 }
  0xed   :  { %v528_v33 = vld [vmem:[#allocation2 + $0x50] sm:$0xff] }
  0xef   :  { %v305_v34 = vpop.f32.mrb[2].mxu1 }
  0xf0   :  { %v773_v35 = vpop.f32.mrb[3].mxu1 }
 0x13a   :  { %v72_v37 = vpop.xlane.xlu1 %71 }
 0x13b   :  { %v73_v40 = vcvt.f32.s32 %v72_v37  ;;  %v531_v37 = vld [vmem:[#allocation2 + $0x68] sm:$0xff] }
 0x13d   :  { %v76_v41 = vadd.s32 %v75_v38, %v73_v40  ;;  %v830_v38 = vpack.c.bf16 %v531_v37, %v530_v36  ;;  %v533_v40 = vld [vmem:[#allocation2 + $0x78] sm:$0xff] }
 0x13e   :  { %v87_v42 = vpop.xlane.xlu1 %86 }
 0x13f   :  { %vm92_vm3 = vcmp.ge.s32.totalorder %v992_v2, %v76_v41  ;;  %v88_v45 = vcvt.f32.s32 %v87_v42  ;;  %v833_v41 = vpack.c.bf16 %v533_v40, %v532_v39  ;;  %v534_v42 = vld [vmem:[#allocation2 + $0x80] sm:$0xff] }
 0x140   :  { %vm94_vm5 = vmand %vm55_vm2, %vm92_vm3 }
 0x141   :  { %vm96_vm6 = vmxor %vm92_vm3, %vm931_vm15  ;;  %v731_v46 = vsel %vm94_vm5, 1.0, %v929_v1  ;;  %v91_v47 = vadd.s32 %v90_v43, %v88_v45  ;;  %v535_v43 = vld [vmem:[#allocation2 + $0x88] sm:$0xff]  ;;  %v536_v45 = vld [vmem:[#allocation2 + $0x90] sm:$0xff]  ;;  %vm516_vm3 = vcmask 785408  }
 0x142   :  { %vm98_vm7 = vmand %vm55_vm2, %vm96_vm6  ;;  %v133_v48 = vrot.slane %v731_v46, %v120_v27  ;;  %v836_v44 = vpack.c.bf16 %v535_v43, %v534_v42  ;;  %v537_v46 = vld [vmem:[#allocation2 + $0x98] sm:$0xff]  ;;  %vm514_vm2 = vcmask 523264  }
 0x143   :  { %v729_v49 = vsel %vm98_vm7, 1.0, %v929_v1  ;;  %vm93_vm8 = vcmp.ge.s32.totalorder %v992_v2, %v91_v47  ;;  %v839_v47 = vpack.c.bf16 %v537_v46, %v536_v45 }
 0x144   :  { %v121_v50 = vrot.slane %v729_v49, %v120_v27  ;;  %vm95_vm10 = vmand %vm1048_vm4, %vm93_vm8  ;;  %v618_v49 = vld [vmem:[%s1154_s5] sm:$0xff] }
 0x145   :  { %vm97_vm12 = vmxor %vm93_vm8, %vm931_vm15  ;;  %v732_v51 = vsel %vm95_vm10, 1.0, %v929_v1  ;;  %vm332_vm15 = vcmask 64512  }
 0x146   :  { %vm99_vm13 = vmand %vm1048_vm4, %vm97_vm12  ;;  %v137_v52 = vrot.slane %v732_v51, %v120_v27  ;;  %v140_v53 = vsel %vm115_vm9, %v121_v50, %v133_v48  ;;  %v619_v50 = vld [vmem:[%s1154_s5 + $0x8] sm:$0xff]  ;;  %v620_v51 = vld [vmem:[%s1154_s5 + $0x10] sm:$0xff] }
 0x147   :  { %v730_v54 = vsel %vm99_vm13, 1.0, %v929_v1  ;;  %v154_v55 = vsel %vm114_vm11, %v147_v29, %v140_v53 }
 0x148   :  { %v125_v56 = vrot.slane %v730_v54, %v120_v27  ;;  %v156_v57 = vmul.f32 -1e+30, %v154_v55  ;;  %v818_v27 = vpack.c.bf16 %v523_v26, %v522_v25  ;;  %v842_v54 = vpack.c.bf16 %v619_v50, %v618_v49  ;;  %v621_v55 = vld [vmem:[%s1154_s5 + $0x18] sm:$0xff]  ;;  %v628_v26 = vld [vmem:[%s1154_s5 + $0x50] sm:$0xff] }
 0x14a   :  { %v233_v58 = vadd.f32 %v232_v32, %v156_v57  ;;  %v141_v59 = vsel %vm115_vm9, %v125_v56, %v137_v52 }
 0x14b   :  { %v155_v60 = vsel %vm114_vm11, %v151_v31, %v141_v59  ;;  %v527_v31 = vld [vmem:[#allocation2 + $0x48] sm:$0xff]  ;;  %v622_v59 = vld [vmem:[%s1154_s5 + $0x20] sm:$0xff] }
 0x14c   :  { %v157_v61 = vmul.f32 -1e+30, %v155_v60  ;;  %v310_v62 = vsel %vm309_vm14, %v233_v58, -inf  ;;  %v824_v32 = vpack.c.bf16 %v527_v31, %v526_v30  ;;  %v623_v60 = vld [vmem:[%s1154_s5 + $0x28] sm:$0xff] }
 0x14d   :  { %311 = vmax.xlane.f32.xlu0 %v310_v62 }
 0x14e   :  { %v306_v63 = vadd.f32 %v305_v34, %v157_v61  ;;  %v529_v34 = vld [vmem:[#allocation2 + $0x58] sm:$0xff] }
 0x14f   :  { %v827_v35 = vpack.c.bf16 %v529_v34, %v528_v33 }
 0x150   :  { %v313_v0 = vsel %vm309_vm14, %v306_v63, -inf }
 0x151   :  { %314 = vmax.xlane.f32.xlu1 %v313_v0 }
 0x1da   :  { %v312_v2 = vpop.xlane.xlu0 %311 }
 0x1db   :  { %v316_v3 = vsub.f32 %v233_v58, %v312_v2  ;;  %v845_v58 = vpack.c.bf16 %v621_v55, %v620_v51 }
 0x1dd   :  { %v318_v4 = vmul.f32 1.442695, %v316_v3 }
 0x1de   :  { %v315_v5 = vpop.xlane.xlu1 %314 }
 0x1df   :  { %870 = vpow2.f32 %v318_v4  ;;  %v317_v6 = vsub.f32 %v306_v63, %v315_v5  ;;  %v848_v5 = vpack.c.bf16 %v623_v60, %v622_v59 }
 0x1e1   :  { %v320_v7 = vmul.f32 1.442695, %v317_v6 }
 0x1e3   :  { %872 = vpow2.f32 %v320_v7 }
 0x1e9   :  { %v871_v9 = vpop.eup %870 }
 0x1ea   :  { %v322_v10 = vsel %vm309_vm14, %v871_v9, 0.0 }
 0x1eb   :  { %323 = vadd.xlane.f32.xlu0 %v322_v10 }
 0x1ed   :  { %v873_v11 = vpop.eup %872 }
 0x1ee   :  { %v325_v12 = vsel %vm309_vm14, %v873_v11, 0.0 }
 0x1ef   :  { %326 = vadd.xlane.f32.xlu1 %v325_v12  ;;  %v624_v12 = vld [vmem:[%s1154_s5 + $0x30] sm:$0xff] }
 0x278   :  { %v324_v13 = vpop.xlane.xlu0 %323 }
 0x279   :  { %874 = vrcp.f32 %v324_v13  ;;  %v625_v13 = vld [vmem:[%s1154_s5 + $0x38] sm:$0xff] }
 0x27c   :  { %v327_v14 = vpop.xlane.xlu1 %326 }
 0x27d   :  { %876 = vrcp.f32 %v327_v14 }
 0x283   :  { %v875_v15 = vpop.eup %874 }
 0x284   :  { %v330_v16 = vmul.f32 %v875_v15, %v871_v9 }
 0x286   :  { %777 = vmatmul.mubr.msk.f32.vlgmr.msra.gmra.mrb[4].mxu1 %vm332_vm15, %v330_v16  ;;  %v851_v16 = vpack.c.bf16 %v625_v13, %v624_v12 }
 0x287   :  { %v877_v17 = vpop.eup %876  ;;  %780 = vmatpush3.msra.mxu1 %v1013_v8  ;;  %781 = vmatprep.mubr.msk.f32.mxu1 %vm930_vm0, %v929_v1  ;;  %v815_v8 = vpack.c.bf16 %v521_v24, %v520_v21 }
 0x288   :  { %v331_v18 = vmul.f32 %v877_v17, %v873_v11  ;;  %841 = vmatprep.subr.bf16.mxu1 %v932_v22  ;;  %v626_v17 = vld [vmem:[%s1154_s5 + $0x40] sm:$0xff] }
 0x289   :  { %816 = vmatpush1.bf16.msra.mxu0 %v815_v8 }
 0x28a   :  { %782 = vmatmul.mubr.msk.f32.vlgmr.msra.gmra.mrb[6].mxu1 %vm332_vm15, %v331_v18  ;;  %817 = vmatprep.subr.bf16.mxu0 %v932_v22  ;;  %v627_v18 = vld [vmem:[%s1154_s5 + $0x48] sm:$0xff] }
 0x28b   :  { %808 = vmatprep.mubr.msk.f32.mxu1 %vm930_vm0, %v929_v1  ;;  %v524_v1 = vld [vmem:[#allocation2 + $0x30] sm:$0xff]  ;;  %vm490_vm0 = vcmask 1041409   ;;  %843 = vmatpush3.bf16.msra.mxu1 %v842_v54  ;;  %v854_v19 = vpack.c.bf16 %v627_v18, %v626_v17 }
 0x28c   :  { %v821_v29 = vpack.c.bf16 %v525_v28, %v524_v1  ;;  %844 = vmatprep.subr.bf16.mxu1 %v932_v22 }
 0x28d   :  { %819 = vmatpush1.bf16.msra.mxu0 %v818_v27  ;;  %v629_v27 = vld [vmem:[%s1154_s5 + $0x58] sm:$0xff]  ;;  %s900_s5 = scalar_lea.vmem %s719_s26, 32 }
 0x28e   :  { %820 = vmatprep.subr.bf16.mxu0 %v932_v22  ;;  %v857_v1 = vpack.c.bf16 %v629_v27, %v628_v26  ;;  %p901_p8 = scmp.ne.s32.totalorder %s719_s26, %s900_s5  ;;  %p906_p10 = scmp.lt.s32.totalorder %s900_s5, %s900_s5 }
 0x28f   :  { %846 = vmatpush3.bf16.msra.mxu1 %v845_v58 }
 0x290   :  { %847 = vmatprep.subr.bf16.mxu1 %v932_v22  ;;  %p907_p11 = por %p906_p10, %p905_p9 }
 0x291   :  { %822 = vmatpush1.bf16.msra.mxu0 %v821_v29 }
 0x292   :  { %823 = vmatprep.subr.bf16.mxu0 %v932_v22  ;;  %p908_p12 = pnand %p907_p11, %p901_p8 }
 0x293   :  { %849 = vmatpush3.bf16.msra.mxu1 %v848_v5 }
 0x294   :  { %850 = vmatprep.subr.bf16.mxu1 %v932_v22 }
 0x295   :  { %825 = vmatpush1.bf16.msra.mxu0 %v824_v32  ;;  %v741_v32 = vld [vmem:[%s1155_s6] ss:$0 sm:$0xff] }
 0x296   :  { %826 = vmatprep.subr.bf16.mxu0 %v932_v22 }
 0x297   :  { %852 = vmatpush3.bf16.msra.mxu1 %v851_v16 }
 0x298   :  { %853 = vmatprep.subr.bf16.mxu1 %v932_v22 }
 0x299   :  { %828 = vmatpush1.bf16.msra.mxu0 %v827_v35 }
 0x29a   :  { %829 = vmatprep.subr.bf16.mxu0 %v932_v22 }
 0x29b   :  { %855 = vmatpush3.bf16.msra.mxu1 %v854_v19 }
 0x29c   :  { %856 = vmatprep.subr.bf16.mxu1 %v932_v22 }
 0x29d   :  { %831 = vmatpush1.bf16.msra.mxu0 %v830_v38 }
 0x29e   :  { %832 = vmatprep.subr.bf16.mxu0 %v932_v22 }
 0x29f   :  { %858 = vmatpush3.bf16.msra.mxu1 %v857_v1 }
 0x2a1   :  { %834 = vmatpush1.bf16.msra.mxu0 %v833_v41 }
 0x2a2   :  { %835 = vmatprep.subr.bf16.mxu0 %v932_v22 }
 0x2a5   :  { %837 = vmatpush1.bf16.msra.mxu0 %v836_v44 }
 0x2a6   :  { %838 = vmatprep.subr.bf16.mxu0 %v932_v22  ;;  %v739_v22 = vld [vmem:[%s1153_s4] ss:$0 sm:$0xff] }
 0x2a9   :  { %840 = vmatpush1.bf16.msra.mxu0 %v839_v47 }
 0x359   :  { %v402_v48 = vpop.f32.mrb[4].mxu1 }
 0x35a   :  { %v778_v52 = vpop.f32.mrb[5].mxu1  ;;  %v481_v53 = vrot.slane %v402_v48, 1  ;;  %v497_v2 = vrot.slane %v402_v48, 2 }
 0x35c   :  { %v487_v56 = vsub.f32 %v402_v48, %v481_v53  ;;  %v485_v57 = vmul.f32 %v481_v53, %v402_v48 }
 0x35d   :  { %v475_v61 = vpop.f32.mrb[6].mxu1 }
 0x35e   :  { %v783_v62 = vpop.f32.mrb[7].mxu1  ;;  %v493_v63 = vsel %vm490_vm0, %v475_v61, %v481_v53  ;;  %v482_v0 = vrot.slane %v475_v61, 1  ;;  %v511_v3 = vrot.slane %v487_v56, 1  ;;  %v489_v4 = vrot.slane %v475_v61, 7 }
 0x35f   :  { %494 = vrot.lane.b32.xlu0 %v493_v63, %s933_s10  ;;  %v504_v10 = vrot.slane %v485_v57, 1 }
 0x360   :  { %v498_v6 = vsel %vm490_vm0, %v482_v0, %v497_v2  ;;  %v488_v7 = vsub.f32 %v475_v61, %v482_v0  ;;  %v486_v9 = vmul.f32 %v482_v0, %v475_v61  ;;  %v491_v11 = vsel %vm490_vm0, %v489_v4, %v402_v48 }
 0x361   :  { %499 = vrot.lane.b32.xlu1 %v498_v6, %s934_s11 }
 0x362   :  { %v512_v14 = vsel %vm490_vm0, %v488_v7, %v511_v3  ;;  %v505_v15 = vsel %vm490_vm0, %v486_v9, %v504_v10 }
 0x363   :  { %740 = vmatprep.mubr.msk.f32.mxu0 %vm159_vm1, %v512_v14 }
 0x365   :  { %506 = vrot.lane.b32.xlu1 %v505_v15, %s935_s16 }
 0x3d1   :  { %v495_v20 = vpop.permute.xlu0 %494 }
 0x3d2   :  { %v513_v23 = vsel %vm159_vm1, %v491_v11, %v495_v20  ;;  %vm710_vm1 = vcmask 17408  }
 0x3d3   :  { %v500_v21 = vpop.permute.xlu1 %499 }
 0x3d4   :  { %v515_v24 = vsel %vm514_vm2, %v513_v23, %v500_v21 }
 0x3d7   :  { %v507_v8 = vpop.permute.xlu1 %506 }
 0x3d8   :  { %v517_v25 = vsel %vm516_vm3, %v515_v24, %v507_v8 }
 0x3d9   :  { %612 = vmatmul.mubr.f32.vlgmr.msra.gmra.mrb[0].mxu0 %v517_v25 }
 0x4ac   :  { %v613_v28 = vpop.f32.mrb[0].mxu0 }
 0x4ad   :  { %v614_v29 = vadd.f32 %v739_v22, %v613_v28  ;;  %v615_v30 = vpop.f32.mrb[1].mxu0 }
 0x4af   :  { %v617_v31 = vmax.f32 %v614_v29, 0.0 }
 0x4b1   :  { %809 = vmatmul.mubr.msk.f32.vlgmr.msra.gmra.mrb[8].mxu1 %vm516_vm3, %v617_v31 }
 0x584   :  { %v706_v33 = vpop.f32.mrb[8].mxu1 }
 0x585   :  { %v707_v34 = vadd.f32 %v741_v32, %v706_v33  ;;  %v810_v35 = vpop.f32.mrb[9].mxu1 }
 0x587   :  { %711 = vst.msk [vmem:[#allocation5] sm:$0x3] %vm710_vm1, %v707_v34 }
 0x588   :  { %911 = shalt.err (!%p908_p12)
}
 0x589   :  { %s912_s28 = scalar_lea.hbm %s1156_s7, 32 }
 0x58a   :  { %p913_p13 = scmp.ne.s32.totalorder %s1156_s7, %s912_s28  ;;  %p916_p0 = scmp.lt.u32.totalorder %s912_s28, %s1156_s7 }
 0x58c   :  { %p918_p1 = pnand %p916_p0, %p913_p13 }
 0x58e   :  { %921 = shalt.err (!%p918_p1)
}
 0x58f   :  { %721 = dma.vmem_to_hbm [thread:$0]  %s719_s26, 32, %s1156_s7, [#allocation4]  }
 0x590   :  { %924 = dma.done.wait [#allocation4], 32  }
 0x591   :  { %925 = vsyncadd [#allocation4], 4294967264 }
 0x592   :  { %725 = vsyncpa [#allocation3], 1 }
 0x593   :  { %726 = vsyncpa [#allocation4], 1 }

</bundles_post_ra>
